<compile_context>
chip_gen: v5e
topology: v5e:2x2
jax: 0.10.0
libtpu: 0.0.40
codegen_flags: <defaults>
</compile_context>

<pallas_src>
import functools

import jax
import jax.numpy as jnp
from jax.experimental import pallas as pl
from jax.experimental.pallas import tpu as pltpu

LANE = 128
_MIB = 1 << 20


def _round_up(x, m):
    return ((x + m - 1) // m) * m


def _vmem_budget_bytes():
    """Per-core VMEM budget the kernel is allowed to plan against."""
    try:
        cap = int(pltpu.get_tpu_info().vmem_capacity_bytes)
    except Exception:
        cap = 64 * _MIB  # conservative lower bound (v7x per-TC; v5e/v6e have 128 MiB)
    return int(cap * 0.85)  # headroom for compiler temporaries / internal scratch


def _choose_tile_m(m, sublane, max_tile):
    """Batch tile: big enough to feed the MXU / amortize per-step overhead.
    Only split the batch when every piece is still a full 128-row MXU tile --
    on single-TensorCore chips (v5e/v6e) the grid is a serial loop, so splitting
    a small batch just adds per-step overhead for zero parallelism gain."""
    m_al = _round_up(m, sublane)
    if m_al >= 2 * max_tile:
        return max_tile
    if m_al >= 2 * LANE:
        return _round_up(pl.cdiv(m_al, 2), LANE)  # 128-multiple, full MXU passes
    return m_al


def _resident_spec(shape, pipeline_mode):
    """Constant-index full block, resident in VMEM across all batch tiles."""
    index_map = lambda i: (0,) * len(shape)
    if pipeline_mode is None:
        return pl.BlockSpec(shape, index_map)
    return pl.BlockSpec(shape, index_map, pipeline_mode=pipeline_mode)


def _fused_vmem_bytes(tm, pdims, compute_dtype, out_dtype, single_buffer_weights):
    cb = jnp.dtype(compute_dtype).itemsize
    ob = jnp.dtype(out_dtype).itemsize
    wmult = 1 if single_buffer_weights else 2
    w = sum(pdims[l] * pdims[l + 1] for l in range(len(pdims) - 1)) * cb * wmult
    b = sum(pdims[1:]) * 4 * wmult
    xio = 2 * tm * pdims[0] * cb + 2 * tm * pdims[-1] * ob   # double-buffered I/O tiles
    acc = tm * max(pdims[1:]) * (4 + cb)                     # f32 acc + compute-dtype copy
    return w + b + xio + acc


# ----------------------------------------------------------------------------
# Fused path: whole FFN in one pallas_call, grid only over the batch dim.
# ----------------------------------------------------------------------------
def _ffn_fused_kernel(*refs, num_layers, compute_dtype):
    """refs = (x_ref, w0, b0, w1, b1, ..., o_ref).  Intermediate activations
    stay on-chip; accumulate / bias / ReLU in f32, cast only for the MXU."""
    x_ref = refs[0]
    o_ref = refs[-1]

    h = x_ref[...]                                   # (tm, K0_pad), compute_dtype
    for layer in range(num_layers):
        w_ref = refs[1 + 2 * layer]                  # (K_pad, N_pad), compute_dtype
        b_ref = refs[2 + 2 * layer]                  # (1, N_pad), f32
        acc = jnp.dot(h, w_ref[...], preferred_element_type=jnp.float32)
        acc = acc + b_ref[...]
        if layer < num_layers - 1:
            acc = jnp.maximum(acc, 0.0)              # ReLU in f32
            # TODO(synk): dropout p>0 (training) would mask + scale here.
            h = acc.astype(compute_dtype)
        else:
            o_ref[...] = acc.astype(o_ref.dtype)


def _ffn_fused(weights, biases, x_p, tm, pdims, compute_dtype, out_dtype,
               budget, single_buffer_weights):
    num_layers = len(weights)
    m_pad = x_p.shape[0]
    pmode = pl.Buffered(1) if single_buffer_weights else None

    flat_inputs = [x_p]
    in_specs = [pl.BlockSpec((tm, pdims[0]), lambda i: (i, 0))]
    for l in range(num_layers):
        flat_inputs += [weights[l], biases[l]]
        in_specs += [
            _resident_spec((pdims[l], pdims[l + 1]), pmode),
            _resident_spec((1, pdims[l + 1]), pmode),
        ]

    needed = _fused_vmem_bytes(tm, pdims, compute_dtype, out_dtype,
                               single_buffer_weights)
    vmem_limit = int(min(max(needed * 5 // 4, 32 * _MIB), budget))

    kernel = functools.partial(_ffn_fused_kernel, num_layers=num_layers,
                               compute_dtype=compute_dtype)
    return pl.pallas_call(
        kernel,
        out_shape=jax.ShapeDtypeStruct((m_pad, pdims[-1]), out_dtype),
        grid_spec=pltpu.PrefetchScalarGridSpec(
            num_scalar_prefetch=0,
            grid=(m_pad // tm,),
            in_specs=in_specs,
            out_specs=pl.BlockSpec((tm, pdims[-1]), lambda i: (i, 0)),
        ),
        compiler_params=pltpu.CompilerParams(
            dimension_semantics=("parallel",),
            vmem_limit_bytes=vmem_limit,
        ),
    )(*flat_inputs)


# ----------------------------------------------------------------------------
# Tiled fallback: per-layer matmul with an M/N/K grid (weights streamed),
# bias + ReLU fused at the last K step.  Used when resident weights would
# exceed the VMEM budget (e.g. big layers on v7x's 64 MiB per-TC VMEM).
# ----------------------------------------------------------------------------
def _linear_kernel(x_ref, w_ref, b_ref, o_ref, acc_ref, *, apply_relu):
    @pl.when(pl.program_id(2) == 0)
    def _():
        acc_ref[...] = jnp.zeros_like(acc_ref)

    acc_ref[...] += jnp.dot(x_ref[...], w_ref[...],
                            preferred_element_type=jnp.float32)

    @pl.when(pl.program_id(2) == pl.num_programs(2) - 1)
    def _():
        acc = acc_ref[...] + b_ref[...]
        if apply_relu:
            acc = jnp.maximum(acc, 0.0)
        o_ref[...] = acc.astype(o_ref.dtype)


def _pick_tile(dim_pad, max_tile):
    t = max(LANE, min(max_tile, dim_pad))
    t = (t // LANE) * LANE
    while dim_pad % t:
        t -= LANE
    return t


def _linear_tiled(x_p, w_p, b_p, apply_relu, out_dtype, vmem_limit, tm):
    m_pad, k_pad = x_p.shape
    n_pad = w_p.shape[1]
    tk = _pick_tile(k_pad, 512)
    tn = _pick_tile(n_pad, 512)
    kernel = functools.partial(_linear_kernel, apply_relu=apply_relu)
    return pl.pallas_call(
        kernel,
        out_shape=jax.ShapeDtypeStruct((m_pad, n_pad), out_dtype),
        grid_spec=pltpu.PrefetchScalarGridSpec(
            num_scalar_prefetch=0,
            grid=(m_pad // tm, n_pad // tn, k_pad // tk),
            in_specs=[
                pl.BlockSpec((tm, tk), lambda i, j, k: (i, k)),
                pl.BlockSpec((tk, tn), lambda i, j, k: (k, j)),
                pl.BlockSpec((1, tn), lambda i, j, k: (0, j)),
            ],
            out_specs=pl.BlockSpec((tm, tn), lambda i, j, k: (i, j)),
            scratch_shapes=[pltpu.VMEM((tm, tn), jnp.float32)],
        ),
        compiler_params=pltpu.CompilerParams(
            dimension_semantics=("parallel", "parallel", "arbitrary"),
            vmem_limit_bytes=int(vmem_limit),
        ),
    )(x_p, w_p, b_p)


def _ffn_tiled(weights, biases, x_p, tm, pdims, compute_dtype, out_dtype, budget):
    """Per-layer weight-streaming path; intermediate activations round-trip HBM
    in compute_dtype (already lane-padded, so no re-padding between layers)."""
    num_layers = len(weights)
    vmem_limit = min(budget, 64 * _MIB)
    h = x_p
    for l in range(num_layers):
        last = l == num_layers - 1
        h = _linear_tiled(h, weights[l], biases[l],
                          apply_relu=not last,
                          out_dtype=out_dtype if last else compute_dtype,
                          vmem_limit=vmem_limit, tm=tm)
    return h


# ----------------------------------------------------------------------------
# Public API
# ----------------------------------------------------------------------------
def prepare_ffn_params(params, compute_dtype=jnp.float32):
    """One-time pad/cast/layout of weights (hoisted out of the per-call path).
    params: list of (W [in, out], b [out])."""
    compute_dtype = jnp.dtype(compute_dtype)
    dims = [params[0][0].shape[0]] + [w.shape[1] for (w, _) in params]
    pdims = [_round_up(d, LANE) for d in dims]
    weights, biases = [], []
    for l, (w, b) in enumerate(params):
        assert w.shape == (dims[l], dims[l + 1]), (w.shape, dims[l], dims[l + 1])
        weights.append(
            jnp.pad(w, ((0, pdims[l] - dims[l]),
                        (0, pdims[l + 1] - dims[l + 1]))).astype(compute_dtype))
        biases.append(
            jnp.pad(b, (0, pdims[l + 1] - dims[l + 1]))
            .astype(jnp.float32).reshape(1, pdims[l + 1]))
    return dict(weights=weights, biases=biases, dims=dims, pdims=pdims,
                compute_dtype=compute_dtype)


def ffn_forward(prepared, x, *, tile_m=256, out_dtype=None, force_tiled=False):
    """FFN forward.  prepared: output of prepare_ffn_params; x: [M, in_dim]."""
    dims, pdims = prepared["dims"], prepared["pdims"]
    compute_dtype = prepared["compute_dtype"]
    weights, biases = prepared["weights"], prepared["biases"]

    M, k0 = x.shape
    assert k0 == dims[0], (k0, dims[0])
    out_dtype = jnp.dtype(x.dtype) if out_dtype is None else jnp.dtype(out_dtype)

    sublane = 16 if compute_dtype == jnp.dtype(jnp.bfloat16) else 8

    # Wide hidden layers: cap tile_m so the f32 accumulator stays small (v7x).
    if max(pdims[1:]) >= 4096:
        tile_m = min(tile_m, 128)

    tm = _choose_tile_m(M, sublane, tile_m)
    m_pad = _round_up(M, tm)

    # Only x is padded/cast per call; weights were prepared once.
    x_p = jnp.pad(x, ((0, m_pad - M), (0, pdims[0] - k0))).astype(compute_dtype)

    budget = _vmem_budget_bytes()
    needed = _fused_vmem_bytes(tm, pdims, compute_dtype, out_dtype,
                               single_buffer_weights=True)

    if force_tiled or needed > budget:
        out_p = _ffn_tiled(weights, biases, x_p, tm, pdims, compute_dtype,
                           out_dtype, budget)
    else:
        try:
            out_p = _ffn_fused(weights, biases, x_p, tm, pdims, compute_dtype,
                               out_dtype, budget, single_buffer_weights=True)
        except Exception:
            # pipeline_mode=pl.Buffered(1) not supported by this JAX/Mosaic:
            # fall back to default double-buffered resident weights.
            out_p = _ffn_fused(weights, biases, x_p, tm, pdims, compute_dtype,
                               out_dtype, budget, single_buffer_weights=False)

    return out_p[:M, : dims[-1]]


# ----------------------------------------------------------------------------
# Init + references
# ----------------------------------------------------------------------------
def init_ffn_params(key, in_dim, hidden_layers, out_dim, dtype=jnp.float32):
    """Deterministic init mirroring nn.Linear shapes (weights kept as [in, out])."""
    dims = [in_dim] + list(hidden_layers) + [out_dim]
    params = []
    for i in range(len(dims) - 1):
        key, kw, kb = jax.random.split(key, 3)
        bound = 1.0 / jnp.sqrt(dims[i])
        w = jax.random.uniform(kw, (dims[i], dims[i + 1]), dtype, -bound, bound)
        b = jax.random.uniform(kb, (dims[i + 1],), dtype, -bound, bound)
        params.append((w, b))
    return params


def ffn_reference(params, x):
    """Pure-JAX f32 reference."""
    n = len(params)
    h = x
    for i, (w, b) in enumerate(params):
        h = h @ w + b
        if i < n - 1:
            h = jnp.maximum(h, 0.0)
    return h


def ffn_reference_bf16(params, x):
    """bf16-input / f32-accumulate reference matching the kernel's bf16 math."""
    n = len(params)
    h = x.astype(jnp.bfloat16)
    for i, (w, b) in enumerate(params):
        acc = jnp.dot(h, w.astype(jnp.bfloat16),
                      preferred_element_type=jnp.float32) + b.astype(jnp.float32)
        if i < n - 1:
            acc = jnp.maximum(acc, 0.0)
            h = acc.astype(jnp.bfloat16)
        else:
            h = acc
    return h


if __name__ == "__main__":
    key = jax.random.PRNGKey(0)
    batch, in_dim, hidden_layers, out_dim = 16, 32, [64, 48], 16

    key, kx = jax.random.split(key)
    x = jax.random.normal(kx, (batch, in_dim), jnp.float32)
    params = init_ffn_params(key, in_dim, hidden_layers, out_dim)

    ref = ffn_reference(params, x)

    # f32 fused path (exact vs reference up to accumulation order).
    prep_f32 = prepare_ffn_params(params, compute_dtype=jnp.float32)
    out = jax.block_until_ready(ffn_forward(prep_f32, x))
    assert out.shape == (batch, out_dim), out.shape
    assert jnp.allclose(out, ref, atol=1e-5, rtol=1e-5), "f32 fused mismatch"

    # Tiled weight-streaming fallback path (forced, for coverage).
    out_t = jax.block_until_ready(ffn_forward(prep_f32, x, force_tiled=True))
    assert out_t.shape == (batch, out_dim), out_t.shape
    assert jnp.allclose(out_t, ref, atol=1e-5, rtol=1e-5), "tiled mismatch"

    # bf16 MXU path: compare against a bf16-cast / f32-accumulate reference.
    prep_bf16 = prepare_ffn_params(params, compute_dtype=jnp.bfloat16)
    out_bf = jax.block_until_ready(ffn_forward(prep_bf16, x))
    ref_bf = ffn_reference_bf16(params, x)
    assert out_bf.shape == (batch, out_dim), out_bf.shape
    assert jnp.allclose(out_bf, ref_bf, atol=5e-2, rtol=5e-2), "bf16 mismatch"

    print("KERNEL_OK")
</pallas_src>

<mosaic_0001>
module attributes {stable_mosaic.version = 11 : i64} {
  func.func @_ffn_fused_kernel(%arg0: i32, %arg1: memref<16x128xf32, #tpu.memory_space<vmem>>, %arg2: memref<128x128xf32, #tpu.memory_space<vmem>>, %arg3: memref<1x128xf32, #tpu.memory_space<vmem>>, %arg4: memref<128x128xf32, #tpu.memory_space<vmem>>, %arg5: memref<1x128xf32, #tpu.memory_space<vmem>>, %arg6: memref<128x128xf32, #tpu.memory_space<vmem>>, %arg7: memref<1x128xf32, #tpu.memory_space<vmem>>, %arg8: memref<16x128xf32, #tpu.memory_space<vmem>>) attributes {dimension_semantics = [#tpu.dimension_semantics<parallel>], iteration_bounds = array<i64: 1>, scalar_prefetch = 0 : i64, scratch_operands = 0 : i64, tpu.core_type = #tpu.core_type<tc>, window_params = [{transform_indices = @transform_0, window_bounds = array<i64: 16, 128>}, {pipeline_mode = #tpu.pipeline_mode<synchronous>, transform_indices = @transform_1, window_bounds = array<i64: 128, 128>}, {pipeline_mode = #tpu.pipeline_mode<synchronous>, transform_indices = @transform_2, window_bounds = array<i64: 1, 128>}, {pipeline_mode = #tpu.pipeline_mode<synchronous>, transform_indices = @transform_3, window_bounds = array<i64: 128, 128>}, {pipeline_mode = #tpu.pipeline_mode<synchronous>, transform_indices = @transform_4, window_bounds = array<i64: 1, 128>}, {pipeline_mode = #tpu.pipeline_mode<synchronous>, transform_indices = @transform_5, window_bounds = array<i64: 128, 128>}, {pipeline_mode = #tpu.pipeline_mode<synchronous>, transform_indices = @transform_6, window_bounds = array<i64: 1, 128>}, {transform_indices = @transform_7, window_bounds = array<i64: 16, 128>}]} {
    %c0 = arith.constant 0 : index
    %c0_0 = arith.constant 0 : index
    %0 = vector.load %arg1[%c0, %c0_0] : memref<16x128xf32, #tpu.memory_space<vmem>>, vector<16x128xf32>
    %c0_1 = arith.constant 0 : index
    %c0_2 = arith.constant 0 : index
    %1 = vector.load %arg2[%c0_1, %c0_2] : memref<128x128xf32, #tpu.memory_space<vmem>>, vector<128x128xf32>
    %cst = arith.constant dense<0.000000e+00> : vector<16x128xf32>
    %2 = tpu.matmul %0, %1, %cst {dimension_numbers = #tpu.dot_dimension_numbers<[1], [0], [0], [1], [0, 0, 1, 1], [], []>} : vector<16x128xf32>, vector<128x128xf32>, vector<16x128xf32> -> vector<16x128xf32>
    %c0_3 = arith.constant 0 : index
    %c0_4 = arith.constant 0 : index
    %3 = vector.load %arg3[%c0_3, %c0_4] : memref<1x128xf32, #tpu.memory_space<vmem>>, vector<1x128xf32>
    %4 = vector.broadcast %3 : vector<1x128xf32> to vector<16x128xf32>
    %5 = arith.addf %2, %4 : vector<16x128xf32>
    %cst_5 = arith.constant 0.000000e+00 : f32
    %6 = vector.broadcast %cst_5 : f32 to vector<16x128xf32>
    %7 = arith.maximumf %5, %6 : vector<16x128xf32>
    %c0_6 = arith.constant 0 : index
    %c0_7 = arith.constant 0 : index
    %8 = vector.load %arg4[%c0_6, %c0_7] : memref<128x128xf32, #tpu.memory_space<vmem>>, vector<128x128xf32>
    %cst_8 = arith.constant dense<0.000000e+00> : vector<16x128xf32>
    %9 = tpu.matmul %7, %8, %cst_8 {dimension_numbers = #tpu.dot_dimension_numbers<[1], [0], [0], [1], [0, 0, 1, 1], [], []>} : vector<16x128xf32>, vector<128x128xf32>, vector<16x128xf32> -> vector<16x128xf32>
    %c0_9 = arith.constant 0 : index
    %c0_10 = arith.constant 0 : index
    %10 = vector.load %arg5[%c0_9, %c0_10] : memref<1x128xf32, #tpu.memory_space<vmem>>, vector<1x128xf32>
    %11 = vector.broadcast %10 : vector<1x128xf32> to vector<16x128xf32>
    %12 = arith.addf %9, %11 : vector<16x128xf32>
    %cst_11 = arith.constant 0.000000e+00 : f32
    %13 = vector.broadcast %cst_11 : f32 to vector<16x128xf32>
    %14 = arith.maximumf %12, %13 : vector<16x128xf32>
    %c0_12 = arith.constant 0 : index
    %c0_13 = arith.constant 0 : index
    %15 = vector.load %arg6[%c0_12, %c0_13] : memref<128x128xf32, #tpu.memory_space<vmem>>, vector<128x128xf32>
    %cst_14 = arith.constant dense<0.000000e+00> : vector<16x128xf32>
    %16 = tpu.matmul %14, %15, %cst_14 {dimension_numbers = #tpu.dot_dimension_numbers<[1], [0], [0], [1], [0, 0, 1, 1], [], []>} : vector<16x128xf32>, vector<128x128xf32>, vector<16x128xf32> -> vector<16x128xf32>
    %c0_15 = arith.constant 0 : index
    %c0_16 = arith.constant 0 : index
    %17 = vector.load %arg7[%c0_15, %c0_16] : memref<1x128xf32, #tpu.memory_space<vmem>>, vector<1x128xf32>
    %18 = vector.broadcast %17 : vector<1x128xf32> to vector<16x128xf32>
    %19 = arith.addf %16, %18 : vector<16x128xf32>
    %c0_17 = arith.constant 0 : index
    %c0_18 = arith.constant 0 : index
    %20 = vector.load %arg8[%c0_17, %c0_18] : memref<16x128xf32, #tpu.memory_space<vmem>>, vector<16x128xf32>
    tpu.vector_store %arg8[%c0_17, %c0_18], %19 {strides = array<i32>} : memref<16x128xf32, #tpu.memory_space<vmem>>, vector<16x128xf32>,
    return
  }
  func.func @transform_0(%arg0: i32) -> (i32, i32) {
    %c0_i32 = arith.constant 0 : i32
    %c0_i32_0 = arith.constant 0 : i32
    return %arg0, %c0_i32 : i32, i32
  }
  func.func @transform_1(%arg0: i32) -> (i32, i32) {
    %c0_i32 = arith.constant 0 : i32
    %c0_i32_0 = arith.constant 0 : i32
    %c0_i32_1 = arith.constant 0 : i32
    return %c0_i32, %c0_i32_0 : i32, i32
  }
  func.func @transform_2(%arg0: i32) -> (i32, i32) {
    %c0_i32 = arith.constant 0 : i32
    %c0_i32_0 = arith.constant 0 : i32
    %c0_i32_1 = arith.constant 0 : i32
    return %c0_i32, %c0_i32_0 : i32, i32
  }
  func.func @transform_3(%arg0: i32) -> (i32, i32) {
    %c0_i32 = arith.constant 0 : i32
    %c0_i32_0 = arith.constant 0 : i32
    %c0_i32_1 = arith.constant 0 : i32
    return %c0_i32, %c0_i32_0 : i32, i32
  }
  func.func @transform_4(%arg0: i32) -> (i32, i32) {
    %c0_i32 = arith.constant 0 : i32
    %c0_i32_0 = arith.constant 0 : i32
    %c0_i32_1 = arith.constant 0 : i32
    return %c0_i32, %c0_i32_0 : i32, i32
  }
  func.func @transform_5(%arg0: i32) -> (i32, i32) {
    %c0_i32 = arith.constant 0 : i32
    %c0_i32_0 = arith.constant 0 : i32
    %c0_i32_1 = arith.constant 0 : i32
    return %c0_i32, %c0_i32_0 : i32, i32
  }
  func.func @transform_6(%arg0: i32) -> (i32, i32) {
    %c0_i32 = arith.constant 0 : i32
    %c0_i32_0 = arith.constant 0 : i32
    %c0_i32_1 = arith.constant 0 : i32
    return %c0_i32, %c0_i32_0 : i32, i32
  }
  func.func @transform_7(%arg0: i32) -> (i32, i32) {
    %c0_i32 = arith.constant 0 : i32
    %c0_i32_0 = arith.constant 0 : i32
    return %arg0, %c0_i32 : i32, i32
  }
}

module attributes {stable_mosaic.version = 11 : i64} {
  func.func @_ffn_fused_kernel(%arg0: i32, %arg1: memref<16x128xf32, #tpu.memory_space<vmem>>, %arg2: memref<128x128xf32, #tpu.memory_space<vmem>>, %arg3: memref<1x128xf32, #tpu.memory_space<vmem>>, %arg4: memref<128x128xf32, #tpu.memory_space<vmem>>, %arg5: memref<1x128xf32, #tpu.memory_space<vmem>>, %arg6: memref<128x128xf32, #tpu.memory_space<vmem>>, %arg7: memref<1x128xf32, #tpu.memory_space<vmem>>, %arg8: memref<16x128xf32, #tpu.memory_space<vmem>>) attributes {dimension_semantics = [#tpu.dimension_semantics<parallel>], iteration_bounds = array<i64: 1>, scalar_prefetch = 0 : i64, scratch_operands = 0 : i64, tpu.core_type = #tpu.core_type<tc>, window_params = [{transform_indices = @transform_0, window_bounds = array<i64: 16, 128>}, {pipeline_mode = #tpu.pipeline_mode<synchronous>, transform_indices = @transform_1, window_bounds = array<i64: 128, 128>}, {pipeline_mode = #tpu.pipeline_mode<synchronous>, transform_indices = @transform_2, window_bounds = array<i64: 1, 128>}, {pipeline_mode = #tpu.pipeline_mode<synchronous>, transform_indices = @transform_3, window_bounds = array<i64: 128, 128>}, {pipeline_mode = #tpu.pipeline_mode<synchronous>, transform_indices = @transform_4, window_bounds = array<i64: 1, 128>}, {pipeline_mode = #tpu.pipeline_mode<synchronous>, transform_indices = @transform_5, window_bounds = array<i64: 128, 128>}, {pipeline_mode = #tpu.pipeline_mode<synchronous>, transform_indices = @transform_6, window_bounds = array<i64: 1, 128>}, {transform_indices = @transform_7, window_bounds = array<i64: 16, 128>}]} {
    %c0 = arith.constant 0 : index
    %c0_0 = arith.constant 0 : index
    %0 = vector.load %arg1[%c0, %c0_0] : memref<16x128xf32, #tpu.memory_space<vmem>>, vector<16x128xf32>
    %c0_1 = arith.constant 0 : index
    %c0_2 = arith.constant 0 : index
    %1 = vector.load %arg2[%c0_1, %c0_2] : memref<128x128xf32, #tpu.memory_space<vmem>>, vector<128x128xf32>
    %cst = arith.constant dense<0.000000e+00> : vector<16x128xf32>
    %2 = tpu.matmul %0, %1, %cst {dimension_numbers = #tpu.dot_dimension_numbers<[1], [0], [0], [1], [0, 0, 1, 1], [], []>} : vector<16x128xf32>, vector<128x128xf32>, vector<16x128xf32> -> vector<16x128xf32>
    %c0_3 = arith.constant 0 : index
    %c0_4 = arith.constant 0 : index
    %3 = vector.load %arg3[%c0_3, %c0_4] : memref<1x128xf32, #tpu.memory_space<vmem>>, vector<1x128xf32>
    %4 = vector.broadcast %3 : vector<1x128xf32> to vector<16x128xf32>
    %5 = arith.addf %2, %4 : vector<16x128xf32>
    %cst_5 = arith.constant 0.000000e+00 : f32
    %6 = vector.broadcast %cst_5 : f32 to vector<16x128xf32>
    %7 = arith.maximumf %5, %6 : vector<16x128xf32>
    %c0_6 = arith.constant 0 : index
    %c0_7 = arith.constant 0 : index
    %8 = vector.load %arg4[%c0_6, %c0_7] : memref<128x128xf32, #tpu.memory_space<vmem>>, vector<128x128xf32>
    %cst_8 = arith.constant dense<0.000000e+00> : vector<16x128xf32>
    %9 = tpu.matmul %7, %8, %cst_8 {dimension_numbers = #tpu.dot_dimension_numbers<[1], [0], [0], [1], [0, 0, 1, 1], [], []>} : vector<16x128xf32>, vector<128x128xf32>, vector<16x128xf32> -> vector<16x128xf32>
    %c0_9 = arith.constant 0 : index
    %c0_10 = arith.constant 0 : index
    %10 = vector.load %arg5[%c0_9, %c0_10] : memref<1x128xf32, #tpu.memory_space<vmem>>, vector<1x128xf32>
    %11 = vector.broadcast %10 : vector<1x128xf32> to vector<16x128xf32>
    %12 = arith.addf %9, %11 : vector<16x128xf32>
    %cst_11 = arith.constant 0.000000e+00 : f32
    %13 = vector.broadcast %cst_11 : f32 to vector<16x128xf32>
    %14 = arith.maximumf %12, %13 : vector<16x128xf32>
    %c0_12 = arith.constant 0 : index
    %c0_13 = arith.constant 0 : index
    %15 = vector.load %arg6[%c0_12, %c0_13] : memref<128x128xf32, #tpu.memory_space<vmem>>, vector<128x128xf32>
    %cst_14 = arith.constant dense<0.000000e+00> : vector<16x128xf32>
    %16 = tpu.matmul %14, %15, %cst_14 {dimension_numbers = #tpu.dot_dimension_numbers<[1], [0], [0], [1], [0, 0, 1, 1], [], []>} : vector<16x128xf32>, vector<128x128xf32>, vector<16x128xf32> -> vector<16x128xf32>
    %c0_15 = arith.constant 0 : index
    %c0_16 = arith.constant 0 : index
    %17 = vector.load %arg7[%c0_15, %c0_16] : memref<1x128xf32, #tpu.memory_space<vmem>>, vector<1x128xf32>
    %18 = vector.broadcast %17 : vector<1x128xf32> to vector<16x128xf32>
    %19 = arith.addf %16, %18 : vector<16x128xf32>
    %c0_17 = arith.constant 0 : index
    %c0_18 = arith.constant 0 : index
    %20 = vector.load %arg8[%c0_17, %c0_18] : memref<16x128xf32, #tpu.memory_space<vmem>>, vector<16x128xf32>
    tpu.vector_store %arg8[%c0_17, %c0_18], %19 {strides = array<i32>} : memref<16x128xf32, #tpu.memory_space<vmem>>, vector<16x128xf32>,
    return
  }
  func.func @transform_0(%arg0: i32) -> (i32, i32) {
    %c0_i32 = arith.constant 0 : i32
    %c0_i32_0 = arith.constant 0 : i32
    return %arg0, %c0_i32 : i32, i32
  }
  func.func @transform_1(%arg0: i32) -> (i32, i32) {
    %c0_i32 = arith.constant 0 : i32
    %c0_i32_0 = arith.constant 0 : i32
    %c0_i32_1 = arith.constant 0 : i32
    return %c0_i32, %c0_i32_0 : i32, i32
  }
  func.func @transform_2(%arg0: i32) -> (i32, i32) {
    %c0_i32 = arith.constant 0 : i32
    %c0_i32_0 = arith.constant 0 : i32
    %c0_i32_1 = arith.constant 0 : i32
    return %c0_i32, %c0_i32_0 : i32, i32
  }
  func.func @transform_3(%arg0: i32) -> (i32, i32) {
    %c0_i32 = arith.constant 0 : i32
    %c0_i32_0 = arith.constant 0 : i32
    %c0_i32_1 = arith.constant 0 : i32
    return %c0_i32, %c0_i32_0 : i32, i32
  }
  func.func @transform_4(%arg0: i32) -> (i32, i32) {
    %c0_i32 = arith.constant 0 : i32
    %c0_i32_0 = arith.constant 0 : i32
    %c0_i32_1 = arith.constant 0 : i32
    return %c0_i32, %c0_i32_0 : i32, i32
  }
  func.func @transform_5(%arg0: i32) -> (i32, i32) {
    %c0_i32 = arith.constant 0 : i32
    %c0_i32_0 = arith.constant 0 : i32
    %c0_i32_1 = arith.constant 0 : i32
    return %c0_i32, %c0_i32_0 : i32, i32
  }
  func.func @transform_6(%arg0: i32) -> (i32, i32) {
    %c0_i32 = arith.constant 0 : i32
    %c0_i32_0 = arith.constant 0 : i32
    %c0_i32_1 = arith.constant 0 : i32
    return %c0_i32, %c0_i32_0 : i32, i32
  }
  func.func @transform_7(%arg0: i32) -> (i32, i32) {
    %c0_i32 = arith.constant 0 : i32
    %c0_i32_0 = arith.constant 0 : i32
    return %arg0, %c0_i32 : i32, i32
  }
}

</mosaic_0001>

<bundles_post_ra>
// kernel: tpu_custom_call.1
= control target key start
LH: loop header
LB: loop body
LE: loop exit
PB: predicated region body
PF: predicated region fallthrough
CT: control target
= control target key end

     0   :  { %12 = vsyncpa [#allocation3], 0  ;;  %s488_s0 = inlined_call_operand.hbm [shape: f32[16,128], index: 0, kind: input, shape index: {}]   ;;  %s489_s1 = inlined_call_operand.hbm [shape: f32[128,128], index: 1, kind: input, shape index: {}]   ;;  %s490_s2 = inlined_call_operand.vmem [shape: f32[1,128], index: 2, kind: input, shape index: {}]   ;;  %s491_s3 = inlined_call_operand.hbm [shape: f32[128,128], index: 3, kind: input, shape index: {}]   ;;  %s492_s4 = inlined_call_operand.vmem [shape: f32[1,128], index: 4, kind: input, shape index: {}]   ;;  %s493_s5 = inlined_call_operand.hbm [shape: f32[128,128], index: 5, kind: input, shape index: {}]   ;;  %s494_s6 = inlined_call_operand.vmem [shape: f32[1,128], index: 6, kind: input, shape index: {}]   ;;  %s495_s7 = inlined_call_operand.hbm [shape: f32[16,128], index: 7, kind: output, shape index: {}]  }
   0x1   :  { %13 = vsyncpa [#allocation6], 0 }
   0x2   :  { %14 = vsyncpa [#allocation9], 0 }
   0x3   :  { %15 = vsyncpa [#allocation4], 0  ;;  %s33_s26 = sshll.u32 %s489_s1, 4  ;;  %s402_s27 = smov [#allocation5]   ;;  %s34_s26 = int_to_ptr.hbm [resolvable:$true] %s33_s26 }
   0x4   :  { %s35_s28 = sshll.u32 %s402_s27, 4  ;;  %s20_s8 = sshll.u32 %s488_s0, 4  ;;  %s36_s28 = int_to_ptr.vmem [resolvable:$true] %s35_s28  ;;  %s21_s8 = int_to_ptr.hbm [resolvable:$true] %s20_s8 }
   0x5   :  { %s403_s9 = smov 128   ;;  %s404_s10 = smov 8  }
   0x6   :  { %41 = dma.hbm_to_vmem [thread:$0]  %s34_s26, 2048, %s36_s28, [#allocation6], %s403_s9, %s403_s9, %s404_s10  }
   0x7   :  { %s405_s11 = smov [#allocation2]   ;;  %s48_s1 = sshll.u32 %s491_s3, 4  ;;  %s49_s1 = int_to_ptr.hbm [resolvable:$true] %s48_s1 }
   0x8   :  { %s22_s12 = sshll.u32 %s405_s11, 4  ;;  %s63_s16 = sshll.u32 %s493_s5, 4  ;;  %s23_s12 = int_to_ptr.vmem [resolvable:$true] %s22_s12  ;;  %s64_s16 = int_to_ptr.hbm [resolvable:$true] %s63_s16 }
   0x9   :  { %28 = dma.hbm_to_vmem [thread:$0]  %s21_s8, 256, %s23_s12, [#allocation3], %s403_s9, %s403_s9, %s404_s10  }
   0xa   :  { %s406_s17 = smov [#allocation7]   ;;  %s407_s19 = smov [#allocation8]  }
   0xb   :  { %s50_s18 = sshll.u32 %s406_s17, 4  ;;  %s65_s3 = sshll.u32 %s407_s19, 4  ;;  %s51_s18 = int_to_ptr.vmem [resolvable:$true] %s50_s18  ;;  %s66_s3 = int_to_ptr.vmem [resolvable:$true] %s65_s3 }
   0xc   :  { %56 = dma.hbm_to_vmem [thread:$0]  %s49_s1, 2048, %s51_s18, [#allocation6], %s403_s9, %s403_s9, %s404_s10  }
   0xd   :  { %71 = dma.hbm_to_vmem [thread:$0]  %s64_s16, 2048, %s66_s3, [#allocation9], %s403_s9, %s403_s9, %s404_s10  }
   0xe   :  { %394 = dma.done.wait [#allocation3], 256  }
   0xf   :  { %395 = vsyncadd [#allocation3], 4294967040 }
  0x10   :  { %396 = dma.done.wait [#allocation6], 4096  }
  0x11   :  { %397 = vsyncadd [#allocation6], 4294963200 }
  0x12   :  { %398 = dma.done.wait [#allocation9], 2048  }
  0x13   :  { %399 = vsyncadd [#allocation9], 4294965248  ;;  %v107_v0 = vld [vmem:[#allocation5 + $0x78] sm:$0xff]  ;;  %v106_v1 = vld [vmem:[#allocation5 + $0x70] sm:$0xff]  ;;  %s408_s24 = smov [#allocation10]  }
  0x14   :  { %112 = vmatpush.msra.mxu0 %v107_v0  ;;  %248 = vmatpush.msra.mxu3 %v107_v0  ;;  %v105_v2 = vld [vmem:[#allocation5 + $0x68] sm:$0xff]  ;;  %v104_v3 = vld [vmem:[#allocation5 + $0x60] sm:$0xff]  ;;  %v103_v4 = vld [vmem:[#allocation5 + $0x58] sm:$0xff]  ;;  %s231_s25 = sshll.u32 %s408_s24, 4  ;;  %s232_s25 = int_to_ptr.vmem [resolvable:$true] %s231_s25 }
  0x15   :  { %v152_v5 = vld [vmem:[#allocation7 + $0x78] sm:$0xff]  ;;  %v151_v6 = vld [vmem:[#allocation7 + $0x70] sm:$0xff]  ;;  %v150_v8 = vld [vmem:[#allocation7 + $0x68] sm:$0xff] }
  0x16   :  { %113 = vmatpush.msra.mxu0 %v106_v1  ;;  %249 = vmatpush.msra.mxu3 %v106_v1  ;;  %v102_v7 = vld [vmem:[#allocation5 + $0x50] sm:$0xff]  ;;  %v101_v9 = vld [vmem:[#allocation5 + $0x48] sm:$0xff]  ;;  %v149_v10 = vld [vmem:[#allocation7 + $0x60] sm:$0xff] }
  0x17   :  { %157 = vmatpush.msra.mxu1 %v152_v5  ;;  %v100_v11 = vld [vmem:[#allocation5 + $0x40] sm:$0xff]  ;;  %v148_v12 = vld [vmem:[#allocation7 + $0x58] sm:$0xff]  ;;  %v147_v14 = vld [vmem:[#allocation7 + $0x50] sm:$0xff] }
  0x18   :  { %114 = vmatpush.msra.mxu0 %v105_v2  ;;  %250 = vmatpush.msra.mxu3 %v105_v2  ;;  %v99_v13 = vld [vmem:[#allocation5 + $0x38] sm:$0xff]  ;;  %v98_v15 = vld [vmem:[#allocation5 + $0x30] sm:$0xff]  ;;  %v146_v16 = vld [vmem:[#allocation7 + $0x48] sm:$0xff] }
  0x19   :  { %158 = vmatpush.msra.mxu1 %v151_v6  ;;  %v97_v17 = vld [vmem:[#allocation5 + $0x28] sm:$0xff]  ;;  %v145_v18 = vld [vmem:[#allocation7 + $0x40] sm:$0xff]  ;;  %v144_v20 = vld [vmem:[#allocation7 + $0x38] sm:$0xff] }
  0x1a   :  { %115 = vmatpush.msra.mxu0 %v104_v3  ;;  %251 = vmatpush.msra.mxu3 %v104_v3  ;;  %v96_v19 = vld [vmem:[#allocation5 + $0x20] sm:$0xff]  ;;  %v95_v21 = vld [vmem:[#allocation5 + $0x18] sm:$0xff]  ;;  %v143_v22 = vld [vmem:[#allocation7 + $0x30] sm:$0xff] }
  0x1b   :  { %159 = vmatpush.msra.mxu1 %v150_v8  ;;  %v94_v23 = vld [vmem:[#allocation5 + $0x10] sm:$0xff]  ;;  %v142_v24 = vld [vmem:[#allocation7 + $0x28] sm:$0xff]  ;;  %v141_v26 = vld [vmem:[#allocation7 + $0x20] sm:$0xff] }
  0x1c   :  { %116 = vmatpush.msra.mxu0 %v103_v4  ;;  %252 = vmatpush.msra.mxu3 %v103_v4  ;;  %v93_v25 = vld [vmem:[#allocation5 + $0x8] sm:$0xff]  ;;  %v92_v27 = vld [vmem:[#allocation5] sm:$0xff]  ;;  %v90_v28 = vld [vmem:[#allocation2] sm:$0xff] }
  0x1d   :  { %160 = vmatpush.msra.mxu1 %v149_v10  ;;  %v91_v29 = vld [vmem:[#allocation2 + $0x8] sm:$0xff]  ;;  %v139_v31 = vld [vmem:[#allocation7 + $0x10] sm:$0xff]  ;;  %v138_v32 = vld [vmem:[#allocation7 + $0x8] sm:$0xff] }
  0x1e   :  { %117 = vmatpush.msra.mxu0 %v102_v7  ;;  %253 = vmatpush.msra.mxu3 %v102_v7  ;;  %v140_v30 = vld [vmem:[#allocation7 + $0x18] sm:$0xff]  ;;  %v137_v33 = vld [vmem:[#allocation7] sm:$0xff]  ;;  %v196_v35 = vld [vmem:[#allocation8 + $0x70] sm:$0xff] }
  0x1f   :  { %161 = vmatpush.msra.mxu1 %v148_v12  ;;  %v197_v34 = vld [vmem:[#allocation8 + $0x78] sm:$0xff]  ;;  %v195_v36 = vld [vmem:[#allocation8 + $0x68] sm:$0xff]  ;;  %v194_v37 = vld [vmem:[#allocation8 + $0x60] sm:$0xff] }
  0x20   :  { %118 = vmatpush.msra.mxu0 %v101_v9  ;;  %254 = vmatpush.msra.mxu3 %v101_v9  ;;  %v193_v38 = vld [vmem:[#allocation8 + $0x58] sm:$0xff]  ;;  %v192_v39 = vld [vmem:[#allocation8 + $0x50] sm:$0xff]  ;;  %v191_v40 = vld [vmem:[#allocation8 + $0x48] sm:$0xff] }
  0x21   :  { %162 = vmatpush.msra.mxu1 %v147_v14  ;;  %202 = vmatpush.msra.mxu2 %v197_v34  ;;  %v190_v41 = vld [vmem:[#allocation8 + $0x40] sm:$0xff]  ;;  %v189_v42 = vld [vmem:[#allocation8 + $0x38] sm:$0xff]  ;;  %v271_v43 = vld [vmem:[%s490_s2] ss:$0 sm:$0xff] }
  0x22   :  { %119 = vmatpush.msra.mxu0 %v100_v11  ;;  %255 = vmatpush.msra.mxu3 %v100_v11  ;;  %v188_v44 = vld [vmem:[#allocation8 + $0x30] sm:$0xff]  ;;  %v187_v45 = vld [vmem:[#allocation8 + $0x28] sm:$0xff]  ;;  %v186_v48 = vld [vmem:[#allocation8 + $0x20] sm:$0xff] }
  0x23   :  { %163 = vmatpush.msra.mxu1 %v146_v16  ;;  %203 = vmatpush.msra.mxu2 %v196_v35  ;;  %v185_v50 = vld [vmem:[#allocation8 + $0x18] sm:$0xff]  ;;  %v184_v54 = vld [vmem:[#allocation8 + $0x10] sm:$0xff]  ;;  %v183_v55 = vld [vmem:[#allocation8 + $0x8] sm:$0xff] }
  0x24   :  { %120 = vmatpush.msra.mxu0 %v99_v13  ;;  %256 = vmatpush.msra.mxu3 %v99_v13  ;;  %v182_v56 = vld [vmem:[#allocation8] sm:$0xff]  ;;  %v272_v57 = vld [vmem:[%s492_s4] ss:$0 sm:$0xff]  ;;  %s233_s4 = sshll.u32 %s495_s7, 4  ;;  %s234_s4 = int_to_ptr.hbm [resolvable:$true] %s233_s4 }
  0x25   :  { %164 = vmatpush.msra.mxu1 %v145_v18  ;;  %204 = vmatpush.msra.mxu2 %v195_v36  ;;  %v273_v0 = vld [vmem:[%s494_s6] ss:$0 sm:$0xff] }
  0x26   :  { %121 = vmatpush.msra.mxu0 %v98_v15  ;;  %257 = vmatpush.msra.mxu3 %v98_v15 }
  0x27   :  { %165 = vmatpush.msra.mxu1 %v144_v20  ;;  %205 = vmatpush.msra.mxu2 %v194_v37 }
  0x28   :  { %122 = vmatpush.msra.mxu0 %v97_v17  ;;  %258 = vmatpush.msra.mxu3 %v97_v17 }
  0x29   :  { %166 = vmatpush.msra.mxu1 %v143_v22  ;;  %206 = vmatpush.msra.mxu2 %v193_v38 }
  0x2a   :  { %123 = vmatpush.msra.mxu0 %v96_v19  ;;  %259 = vmatpush.msra.mxu3 %v96_v19 }
  0x2b   :  { %167 = vmatpush.msra.mxu1 %v142_v24  ;;  %207 = vmatpush.msra.mxu2 %v192_v39 }
  0x2c   :  { %124 = vmatpush.msra.mxu0 %v95_v21  ;;  %260 = vmatpush.msra.mxu3 %v95_v21 }
  0x2d   :  { %168 = vmatpush.msra.mxu1 %v141_v26  ;;  %208 = vmatpush.msra.mxu2 %v191_v40 }
  0x2e   :  { %125 = vmatpush.msra.mxu0 %v94_v23  ;;  %261 = vmatpush.msra.mxu3 %v94_v23 }
  0x2f   :  { %169 = vmatpush.msra.mxu1 %v140_v30  ;;  %209 = vmatpush.msra.mxu2 %v190_v41 }
  0x30   :  { %126 = vmatpush.msra.mxu0 %v93_v25  ;;  %262 = vmatpush.msra.mxu3 %v93_v25 }
  0x31   :  { %170 = vmatpush.msra.mxu1 %v139_v31  ;;  %210 = vmatpush.msra.mxu2 %v189_v42 }
  0x32   :  { %127 = vmatpush.msra.mxu0 %v92_v27  ;;  %263 = vmatpush.msra.mxu3 %v92_v27 }
  0x33   :  { %128 = vmatmul.f32.vlgmr.msra.gmra.mxu0 %v90_v28  ;;  %131 = vmatmul.f32.vlgmr.msra.gmra.mxu3 %v91_v29 }
  0x34   :  { %171 = vmatpush.msra.mxu1 %v138_v32  ;;  %211 = vmatpush.msra.mxu2 %v188_v44 }
  0x36   :  { %172 = vmatpush.msra.mxu1 %v137_v33  ;;  %212 = vmatpush.msra.mxu2 %v187_v45 }
  0x38   :  { %213 = vmatpush.msra.mxu2 %v186_v48 }
  0x3a   :  { %214 = vmatpush.msra.mxu2 %v185_v50 }
  0x3c   :  { %215 = vmatpush.msra.mxu2 %v184_v54 }
  0x3e   :  { %216 = vmatpush.msra.mxu2 %v183_v55 }
  0x40   :  { %217 = vmatpush.msra.mxu2 %v182_v56 }
  0xb0   :  { %v129_v46 = vpop.f32.mrf.mxu0 }
  0xb1   :  { %v130_v47 = vadd.f32 %v271_v43, %v129_v46 }
  0xb3   :  { %v135_v49 = vmax.f32 %v130_v47, 0.0 }
  0xb5   :  { %173 = vmatmul.f32.vlgmr.msra.gmra.mxu1 %v135_v49 }
  0xb6   :  { %v132_v51 = vpop.f32.mrf.mxu3 }
  0xb7   :  { %v133_v52 = vadd.f32 %v271_v43, %v132_v51 }
  0xb9   :  { %v136_v53 = vmax.f32 %v133_v52, 0.0 }
  0xbd   :  { %176 = vmatmul.f32.gmra.mxu1 %v136_v53 }
 0x132   :  { %v174_v58 = vpop.f32.mrf.mxu1 }
 0x133   :  { %v175_v59 = vadd.f32 %v272_v57, %v174_v58 }
 0x135   :  { %v180_v60 = vmax.f32 %v175_v59, 0.0 }
 0x137   :  { %218 = vmatmul.f32.vlgmr.msra.gmra.mxu2 %v180_v60 }
 0x13a   :  { %v177_v61 = vpop.f32.mrf.mxu1 }
 0x13b   :  { %v178_v62 = vadd.f32 %v272_v57, %v177_v61 }
 0x13d   :  { %v181_v63 = vmax.f32 %v178_v62, 0.0 }
 0x13f   :  { %221 = vmatmul.f32.gmra.mxu2 %v181_v63 }
 0x1ba   :  { %v219_v1 = vpop.f32.mrf.mxu2 }
 0x1bb   :  { %v220_v2 = vadd.f32 %v273_v0, %v219_v1 }
 0x1bd   :  { %225 = vst [vmem:[#allocation10] sm:$0xff] %v220_v2 }
 0x1c2   :  { %v222_v3 = vpop.f32.mrf.mxu2 }
 0x1c3   :  { %v223_v4 = vadd.f32 %v273_v0, %v222_v3 }
 0x1c5   :  { %226 = vst [vmem:[#allocation10 + $0x8] sm:$0xff] %v223_v4 }
 0x1c6   :  { %239 = dma.vmem_to_hbm [thread:$0]  %s232_s25, 256, %s234_s4, [#allocation4], %s403_s9, %s403_s9, %s404_s10  }
 0x1c7   :  { %400 = dma.done.wait [#allocation4], 256  }
 0x1c8   :  { %401 = vsyncadd [#allocation4], 4294967040 }
 0x1c9   :  { %244 = vsyncpa [#allocation3], 1 }
 0x1ca   :  { %245 = vsyncpa [#allocation6], 1 }
 0x1cb   :  { %246 = vsyncpa [#allocation9], 1 }
 0x1cc   :  { %247 = vsyncpa [#allocation4], 1 }

// kernel: tpu_custom_call.1
= control target key start
LH: loop header
LB: loop body
LE: loop exit
PB: predicated region body
PF: predicated region fallthrough
CT: control target
= control target key end

     0   :  { %12 = vsyncpa [#allocation3], 0  ;;  %s488_s0 = inlined_call_operand.hbm [shape: f32[16,128], index: 0, kind: input, shape index: {}]   ;;  %s489_s1 = inlined_call_operand.hbm [shape: f32[128,128], index: 1, kind: input, shape index: {}]   ;;  %s490_s2 = inlined_call_operand.vmem [shape: f32[1,128], index: 2, kind: input, shape index: {}]   ;;  %s491_s3 = inlined_call_operand.hbm [shape: f32[128,128], index: 3, kind: input, shape index: {}]   ;;  %s492_s4 = inlined_call_operand.vmem [shape: f32[1,128], index: 4, kind: input, shape index: {}]   ;;  %s493_s5 = inlined_call_operand.hbm [shape: f32[128,128], index: 5, kind: input, shape index: {}]   ;;  %s494_s6 = inlined_call_operand.vmem [shape: f32[1,128], index: 6, kind: input, shape index: {}]   ;;  %s495_s7 = inlined_call_operand.hbm [shape: f32[16,128], index: 7, kind: output, shape index: {}]  }
   0x1   :  { %13 = vsyncpa [#allocation6], 0 }
   0x2   :  { %14 = vsyncpa [#allocation9], 0 }
   0x3   :  { %15 = vsyncpa [#allocation4], 0  ;;  %s33_s26 = sshll.u32 %s489_s1, 4  ;;  %s402_s27 = smov [#allocation5]   ;;  %s34_s26 = int_to_ptr.hbm [resolvable:$true] %s33_s26 }
   0x4   :  { %s35_s28 = sshll.u32 %s402_s27, 4  ;;  %s20_s8 = sshll.u32 %s488_s0, 4  ;;  %s36_s28 = int_to_ptr.vmem [resolvable:$true] %s35_s28  ;;  %s21_s8 = int_to_ptr.hbm [resolvable:$true] %s20_s8 }
   0x5   :  { %s403_s9 = smov 128   ;;  %s404_s10 = smov 8  }
   0x6   :  { %41 = dma.hbm_to_vmem [thread:$0]  %s34_s26, 2048, %s36_s28, [#allocation6], %s403_s9, %s403_s9, %s404_s10  }
   0x7   :  { %s405_s11 = smov [#allocation2]   ;;  %s48_s1 = sshll.u32 %s491_s3, 4  ;;  %s49_s1 = int_to_ptr.hbm [resolvable:$true] %s48_s1 }
   0x8   :  { %s22_s12 = sshll.u32 %s405_s11, 4  ;;  %s63_s16 = sshll.u32 %s493_s5, 4  ;;  %s23_s12 = int_to_ptr.vmem [resolvable:$true] %s22_s12  ;;  %s64_s16 = int_to_ptr.hbm [resolvable:$true] %s63_s16 }
   0x9   :  { %28 = dma.hbm_to_vmem [thread:$0]  %s21_s8, 256, %s23_s12, [#allocation3], %s403_s9, %s403_s9, %s404_s10  }
   0xa   :  { %s406_s17 = smov [#allocation7]   ;;  %s407_s19 = smov [#allocation8]  }
   0xb   :  { %s50_s18 = sshll.u32 %s406_s17, 4  ;;  %s65_s3 = sshll.u32 %s407_s19, 4  ;;  %s51_s18 = int_to_ptr.vmem [resolvable:$true] %s50_s18  ;;  %s66_s3 = int_to_ptr.vmem [resolvable:$true] %s65_s3 }
   0xc   :  { %56 = dma.hbm_to_vmem [thread:$0]  %s49_s1, 2048, %s51_s18, [#allocation6], %s403_s9, %s403_s9, %s404_s10  }
   0xd   :  { %71 = dma.hbm_to_vmem [thread:$0]  %s64_s16, 2048, %s66_s3, [#allocation9], %s403_s9, %s403_s9, %s404_s10  }
   0xe   :  { %394 = dma.done.wait [#allocation3], 256  }
   0xf   :  { %395 = vsyncadd [#allocation3], 4294967040 }
  0x10   :  { %396 = dma.done.wait [#allocation6], 4096  }
  0x11   :  { %397 = vsyncadd [#allocation6], 4294963200 }
  0x12   :  { %398 = dma.done.wait [#allocation9], 2048  }
  0x13   :  { %399 = vsyncadd [#allocation9], 4294965248  ;;  %v107_v0 = vld [vmem:[#allocation5 + $0x78] sm:$0xff]  ;;  %v106_v1 = vld [vmem:[#allocation5 + $0x70] sm:$0xff]  ;;  %s408_s24 = smov [#allocation10]  }
  0x14   :  { %112 = vmatpush.msra.mxu0 %v107_v0  ;;  %248 = vmatpush.msra.mxu3 %v107_v0  ;;  %v105_v2 = vld [vmem:[#allocation5 + $0x68] sm:$0xff]  ;;  %v104_v3 = vld [vmem:[#allocation5 + $0x60] sm:$0xff]  ;;  %v103_v4 = vld [vmem:[#allocation5 + $0x58] sm:$0xff]  ;;  %s231_s25 = sshll.u32 %s408_s24, 4  ;;  %s232_s25 = int_to_ptr.vmem [resolvable:$true] %s231_s25 }
  0x15   :  { %v152_v5 = vld [vmem:[#allocation7 + $0x78] sm:$0xff]  ;;  %v151_v6 = vld [vmem:[#allocation7 + $0x70] sm:$0xff]  ;;  %v150_v8 = vld [vmem:[#allocation7 + $0x68] sm:$0xff] }
  0x16   :  { %113 = vmatpush.msra.mxu0 %v106_v1  ;;  %249 = vmatpush.msra.mxu3 %v106_v1  ;;  %v102_v7 = vld [vmem:[#allocation5 + $0x50] sm:$0xff]  ;;  %v101_v9 = vld [vmem:[#allocation5 + $0x48] sm:$0xff]  ;;  %v149_v10 = vld [vmem:[#allocation7 + $0x60] sm:$0xff] }
  0x17   :  { %157 = vmatpush.msra.mxu1 %v152_v5  ;;  %v100_v11 = vld [vmem:[#allocation5 + $0x40] sm:$0xff]  ;;  %v148_v12 = vld [vmem:[#allocation7 + $0x58] sm:$0xff]  ;;  %v147_v14 = vld [vmem:[#allocation7 + $0x50] sm:$0xff] }
  0x18   :  { %114 = vmatpush.msra.mxu0 %v105_v2  ;;  %250 = vmatpush.msra.mxu3 %v105_v2  ;;  %v99_v13 = vld [vmem:[#allocation5 + $0x38] sm:$0xff]  ;;  %v98_v15 = vld [vmem:[#allocation5 + $0x30] sm:$0xff]  ;;  %v146_v16 = vld [vmem:[#allocation7 + $0x48] sm:$0xff] }
  0x19   :  { %158 = vmatpush.msra.mxu1 %v151_v6  ;;  %v97_v17 = vld [vmem:[#allocation5 + $0x28] sm:$0xff]  ;;  %v145_v18 = vld [vmem:[#allocation7 + $0x40] sm:$0xff]  ;;  %v144_v20 = vld [vmem:[#allocation7 + $0x38] sm:$0xff] }
  0x1a   :  { %115 = vmatpush.msra.mxu0 %v104_v3  ;;  %251 = vmatpush.msra.mxu3 %v104_v3  ;;  %v96_v19 = vld [vmem:[#allocation5 + $0x20] sm:$0xff]  ;;  %v95_v21 = vld [vmem:[#allocation5 + $0x18] sm:$0xff]  ;;  %v143_v22 = vld [vmem:[#allocation7 + $0x30] sm:$0xff] }
  0x1b   :  { %159 = vmatpush.msra.mxu1 %v150_v8  ;;  %v94_v23 = vld [vmem:[#allocation5 + $0x10] sm:$0xff]  ;;  %v142_v24 = vld [vmem:[#allocation7 + $0x28] sm:$0xff]  ;;  %v141_v26 = vld [vmem:[#allocation7 + $0x20] sm:$0xff] }
  0x1c   :  { %116 = vmatpush.msra.mxu0 %v103_v4  ;;  %252 = vmatpush.msra.mxu3 %v103_v4  ;;  %v93_v25 = vld [vmem:[#allocation5 + $0x8] sm:$0xff]  ;;  %v92_v27 = vld [vmem:[#allocation5] sm:$0xff]  ;;  %v90_v28 = vld [vmem:[#allocation2] sm:$0xff] }
  0x1d   :  { %160 = vmatpush.msra.mxu1 %v149_v10  ;;  %v91_v29 = vld [vmem:[#allocation2 + $0x8] sm:$0xff]  ;;  %v139_v31 = vld [vmem:[#allocation7 + $0x10] sm:$0xff]  ;;  %v138_v32 = vld [vmem:[#allocation7 + $0x8] sm:$0xff] }
  0x1e   :  { %117 = vmatpush.msra.mxu0 %v102_v7  ;;  %253 = vmatpush.msra.mxu3 %v102_v7  ;;  %v140_v30 = vld [vmem:[#allocation7 + $0x18] sm:$0xff]  ;;  %v137_v33 = vld [vmem:[#allocation7] sm:$0xff]  ;;  %v196_v35 = vld [vmem:[#allocation8 + $0x70] sm:$0xff] }
  0x1f   :  { %161 = vmatpush.msra.mxu1 %v148_v12  ;;  %v197_v34 = vld [vmem:[#allocation8 + $0x78] sm:$0xff]  ;;  %v195_v36 = vld [vmem:[#allocation8 + $0x68] sm:$0xff]  ;;  %v194_v37 = vld [vmem:[#allocation8 + $0x60] sm:$0xff] }
  0x20   :  { %118 = vmatpush.msra.mxu0 %v101_v9  ;;  %254 = vmatpush.msra.mxu3 %v101_v9  ;;  %v193_v38 = vld [vmem:[#allocation8 + $0x58] sm:$0xff]  ;;  %v192_v39 = vld [vmem:[#allocation8 + $0x50] sm:$0xff]  ;;  %v191_v40 = vld [vmem:[#allocation8 + $0x48] sm:$0xff] }
  0x21   :  { %162 = vmatpush.msra.mxu1 %v147_v14  ;;  %202 = vmatpush.msra.mxu2 %v197_v34  ;;  %v190_v41 = vld [vmem:[#allocation8 + $0x40] sm:$0xff]  ;;  %v189_v42 = vld [vmem:[#allocation8 + $0x38] sm:$0xff]  ;;  %v271_v43 = vld [vmem:[%s490_s2] ss:$0 sm:$0xff] }
  0x22   :  { %119 = vmatpush.msra.mxu0 %v100_v11  ;;  %255 = vmatpush.msra.mxu3 %v100_v11  ;;  %v188_v44 = vld [vmem:[#allocation8 + $0x30] sm:$0xff]  ;;  %v187_v45 = vld [vmem:[#allocation8 + $0x28] sm:$0xff]  ;;  %v186_v48 = vld [vmem:[#allocation8 + $0x20] sm:$0xff] }
  0x23   :  { %163 = vmatpush.msra.mxu1 %v146_v16  ;;  %203 = vmatpush.msra.mxu2 %v196_v35  ;;  %v185_v50 = vld [vmem:[#allocation8 + $0x18] sm:$0xff]  ;;  %v184_v54 = vld [vmem:[#allocation8 + $0x10] sm:$0xff]  ;;  %v183_v55 = vld [vmem:[#allocation8 + $0x8] sm:$0xff] }
  0x24   :  { %120 = vmatpush.msra.mxu0 %v99_v13  ;;  %256 = vmatpush.msra.mxu3 %v99_v13  ;;  %v182_v56 = vld [vmem:[#allocation8] sm:$0xff]  ;;  %v272_v57 = vld [vmem:[%s492_s4] ss:$0 sm:$0xff]  ;;  %s233_s4 = sshll.u32 %s495_s7, 4  ;;  %s234_s4 = int_to_ptr.hbm [resolvable:$true] %s233_s4 }
  0x25   :  { %164 = vmatpush.msra.mxu1 %v145_v18  ;;  %204 = vmatpush.msra.mxu2 %v195_v36  ;;  %v273_v0 = vld [vmem:[%s494_s6] ss:$0 sm:$0xff] }
  0x26   :  { %121 = vmatpush.msra.mxu0 %v98_v15  ;;  %257 = vmatpush.msra.mxu3 %v98_v15 }
  0x27   :  { %165 = vmatpush.msra.mxu1 %v144_v20  ;;  %205 = vmatpush.msra.mxu2 %v194_v37 }
  0x28   :  { %122 = vmatpush.msra.mxu0 %v97_v17  ;;  %258 = vmatpush.msra.mxu3 %v97_v17 }
  0x29   :  { %166 = vmatpush.msra.mxu1 %v143_v22  ;;  %206 = vmatpush.msra.mxu2 %v193_v38 }
  0x2a   :  { %123 = vmatpush.msra.mxu0 %v96_v19  ;;  %259 = vmatpush.msra.mxu3 %v96_v19 }
  0x2b   :  { %167 = vmatpush.msra.mxu1 %v142_v24  ;;  %207 = vmatpush.msra.mxu2 %v192_v39 }
  0x2c   :  { %124 = vmatpush.msra.mxu0 %v95_v21  ;;  %260 = vmatpush.msra.mxu3 %v95_v21 }
  0x2d   :  { %168 = vmatpush.msra.mxu1 %v141_v26  ;;  %208 = vmatpush.msra.mxu2 %v191_v40 }
  0x2e   :  { %125 = vmatpush.msra.mxu0 %v94_v23  ;;  %261 = vmatpush.msra.mxu3 %v94_v23 }
  0x2f   :  { %169 = vmatpush.msra.mxu1 %v140_v30  ;;  %209 = vmatpush.msra.mxu2 %v190_v41 }
  0x30   :  { %126 = vmatpush.msra.mxu0 %v93_v25  ;;  %262 = vmatpush.msra.mxu3 %v93_v25 }
  0x31   :  { %170 = vmatpush.msra.mxu1 %v139_v31  ;;  %210 = vmatpush.msra.mxu2 %v189_v42 }
  0x32   :  { %127 = vmatpush.msra.mxu0 %v92_v27  ;;  %263 = vmatpush.msra.mxu3 %v92_v27 }
  0x33   :  { %128 = vmatmul.f32.vlgmr.msra.gmra.mxu0 %v90_v28  ;;  %131 = vmatmul.f32.vlgmr.msra.gmra.mxu3 %v91_v29 }
  0x34   :  { %171 = vmatpush.msra.mxu1 %v138_v32  ;;  %211 = vmatpush.msra.mxu2 %v188_v44 }
  0x36   :  { %172 = vmatpush.msra.mxu1 %v137_v33  ;;  %212 = vmatpush.msra.mxu2 %v187_v45 }
  0x38   :  { %213 = vmatpush.msra.mxu2 %v186_v48 }
  0x3a   :  { %214 = vmatpush.msra.mxu2 %v185_v50 }
  0x3c   :  { %215 = vmatpush.msra.mxu2 %v184_v54 }
  0x3e   :  { %216 = vmatpush.msra.mxu2 %v183_v55 }
  0x40   :  { %217 = vmatpush.msra.mxu2 %v182_v56 }
  0xb0   :  { %v129_v46 = vpop.f32.mrf.mxu0 }
  0xb1   :  { %v130_v47 = vadd.f32 %v271_v43, %v129_v46 }
  0xb3   :  { %v135_v49 = vmax.f32 %v130_v47, 0.0 }
  0xb5   :  { %173 = vmatmul.f32.vlgmr.msra.gmra.mxu1 %v135_v49 }
  0xb6   :  { %v132_v51 = vpop.f32.mrf.mxu3 }
  0xb7   :  { %v133_v52 = vadd.f32 %v271_v43, %v132_v51 }
  0xb9   :  { %v136_v53 = vmax.f32 %v133_v52, 0.0 }
  0xbd   :  { %176 = vmatmul.f32.gmra.mxu1 %v136_v53 }
 0x132   :  { %v174_v58 = vpop.f32.mrf.mxu1 }
 0x133   :  { %v175_v59 = vadd.f32 %v272_v57, %v174_v58 }
 0x135   :  { %v180_v60 = vmax.f32 %v175_v59, 0.0 }
 0x137   :  { %218 = vmatmul.f32.vlgmr.msra.gmra.mxu2 %v180_v60 }
 0x13a   :  { %v177_v61 = vpop.f32.mrf.mxu1 }
 0x13b   :  { %v178_v62 = vadd.f32 %v272_v57, %v177_v61 }
 0x13d   :  { %v181_v63 = vmax.f32 %v178_v62, 0.0 }
 0x13f   :  { %221 = vmatmul.f32.gmra.mxu2 %v181_v63 }
 0x1ba   :  { %v219_v1 = vpop.f32.mrf.mxu2 }
 0x1bb   :  { %v220_v2 = vadd.f32 %v273_v0, %v219_v1 }
 0x1bd   :  { %225 = vst [vmem:[#allocation10] sm:$0xff] %v220_v2 }
 0x1c2   :  { %v222_v3 = vpop.f32.mrf.mxu2 }
 0x1c3   :  { %v223_v4 = vadd.f32 %v273_v0, %v222_v3 }
 0x1c5   :  { %226 = vst [vmem:[#allocation10 + $0x8] sm:$0xff] %v223_v4 }
 0x1c6   :  { %239 = dma.vmem_to_hbm [thread:$0]  %s232_s25, 256, %s234_s4, [#allocation4], %s403_s9, %s403_s9, %s404_s10  }
 0x1c7   :  { %400 = dma.done.wait [#allocation4], 256  }
 0x1c8   :  { %401 = vsyncadd [#allocation4], 4294967040 }
 0x1c9   :  { %244 = vsyncpa [#allocation3], 1 }
 0x1ca   :  { %245 = vsyncpa [#allocation6], 1 }
 0x1cb   :  { %246 = vsyncpa [#allocation9], 1 }
 0x1cc   :  { %247 = vsyncpa [#allocation4], 1 }

</bundles_post_ra>
